<compile_context>
chip_gen: v5e
topology: v5e:2x2
jax: 0.10.0
libtpu: 0.0.40
codegen_flags: <defaults>
</compile_context>

<pallas_src>
import functools

import jax
import jax.numpy as jnp
from jax.experimental import pallas as pl
from jax.experimental.pallas import tpu as pltpu


def bah_attn_kernel(x_ref, mem_ref, w1_ref, b1_ref, w2_ref, b2_ref, vw_ref,
                    ctx_ref, score_ref, *, sl_valid):
    # x_ref:   (BT, I)              mem_ref:  (BT, SLp, Mp)
    # w1_ref:  (I, Hp)   b1_ref:    (1, Hp)
    # w2_ref:  (Mp, Hp)  b2_ref:    (1, Hp)
    # vw_ref:  (1, 1, Hp)
    # ctx_ref: (BT, Mp)             score_ref:(BT, SLp)
    bt, sl_pad, m_pad = mem_ref.shape
    h_pad = w1_ref.shape[1]

    x = x_ref[...]                                      # (BT, I), native dtype
    mem = mem_ref[...]                                  # (BT, SLp, Mp), native dtype

    # lin1 on the MXU with f32 accumulation: (BT, Hp)
    h_x = jnp.dot(x, w1_ref[...], preferred_element_type=jnp.float32) + b1_ref[...]

    # lin2 flattened into one big MXU matmul: (BT*SLp, Mp) @ (Mp, Hp) -> (BT, SLp, Hp)
    # The reshape is a free view because SLp % 8 == 0 and Mp % 128 == 0.
    mem_flat = mem.reshape(bt * sl_pad, m_pad)
    h_m = jnp.dot(mem_flat, w2_ref[...], preferred_element_type=jnp.float32) + b2_ref[...]
    h_m = h_m.reshape(bt, sl_pad, h_pad)

    # tanh on the EUP. In bf16 when the inputs are bf16 (v6e/v7x: ~2x throughput);
    # softmax math stays f32 below.
    pre = h_x[:, None, :] + h_m                         # (BT, SLp, Hp), f32
    if x_ref.dtype == jnp.bfloat16:
        t = jnp.tanh(pre.astype(jnp.bfloat16)).astype(jnp.float32)
    else:
        t = jnp.tanh(pre)

    # v-projection: VPU multiply + lane reduce over Hp -> lane-major logits (BT, SLp).
    # (v bias omitted: softmax is shift-invariant for the scalar bias.)
    logits = jnp.sum(t * vw_ref[...], axis=-1)          # (BT, SLp), f32

    # Mask padded sequence positions so they get zero probability.
    if sl_valid < sl_pad:
        lane = jax.lax.broadcasted_iota(jnp.int32, (bt, sl_pad), 1)
        logits = jnp.where(lane < sl_valid, logits, jnp.float32(-1e30))

    # Numerically stable softmax over the sequence axis (last axis = lanes).
    m_max = jnp.max(logits, axis=-1, keepdims=True)     # (BT, 1)
    e = jnp.exp(logits - m_max)                         # (BT, SLp)
    denom = jnp.sum(e, axis=-1, keepdims=True)          # (BT, 1)
    probs = e / denom                                   # exact: rows sum to 1

    # Context on the VPU + sublane reduce over SL (frees the MXU; a batched
    # (BT,1,SL)@(BT,SL,M) einsum would run BT near-empty MXU pushes).
    ctx = jnp.sum(probs[:, :, None] * mem.astype(jnp.float32), axis=1)   # (BT, Mp)

    ctx_ref[...] = ctx.astype(ctx_ref.dtype)
    score_ref[...] = probs.astype(score_ref.dtype)


def _round_up(a, b):
    return -(-a // b) * b


def bah_attn_pallas(x, memory, params, block_bs=None):
    """x: (bs, input_size); memory: (bs, sl, hidden*direction).

    block_bs: optional explicit batch tile. If None, it is chosen so that
    BT*SL >= 256 MXU rows, subject to a conservative VMEM budget (sized for
    v7x's 64 MiB VMEM), and shrunk to give >=2 grid steps when bs allows it.
    """
    w1, b1, w2, b2, vw, vb = params
    del vb  # softmax is shift-invariant: the scalar v-bias cannot affect the output.

    bs, input_size = x.shape
    _, sl, mem_dim = memory.shape
    hidden = w1.shape[1]
    # Shift-invariance of softmax only covers a bias broadcast uniformly over sl,
    # i.e. v must be a single output unit.
    assert vw.size == hidden, "v must have a single output unit"

    dtype = x.dtype
    itemsize = jnp.dtype(dtype).itemsize

    # Lane/sublane-friendly padded dims.
    h_pad = _round_up(hidden, 128)
    m_pad = _round_up(mem_dim, 128)
    sl_pad = _round_up(sl, 8)

    min_bt = 16 if itemsize == 2 else 8

    if block_bs is None:
        # Target >=256 rows for the flattened (BT*SLp, Mp)@(Mp, Hp) lin2 matmul.
        bt = max(min_bt, _round_up(-(-256 // sl_pad), min_bt))
        # Per-batch-row VMEM bytes: double-buffered memory/x/output tiles plus the
        # f32 h_m, tanh and probs*mem temporaries.
        per_row = (2 * sl_pad * m_pad * itemsize
                   + 4 * sl_pad * (2 * h_pad + m_pad)
                   + 2 * (m_pad + sl_pad) * itemsize
                   + 2 * input_size * itemsize)
        fixed = 2 * (input_size * h_pad + m_pad * h_pad + 3 * h_pad) * itemsize
        budget = 28 * 1024 * 1024   # conservative: fits v7x (64 MiB physical VMEM)
        bt_cap = max(min_bt, ((budget - fixed) // per_row) // min_bt * min_bt)
        bt = min(bt, bt_cap)
        # Don't tile past the (rounded-up) batch.
        bs_ceil = _round_up(bs, min_bt)
        bt = min(bt, bs_ceil)
        # Prefer >=2 grid steps (v7x megacore) when the batch allows it.
        if bt >= bs_ceil and bs_ceil >= 2 * min_bt:
            bt = max(min_bt, (bs_ceil // 2) // min_bt * min_bt)
    else:
        bt = _round_up(int(block_bs), min_bt)

    bs_pad = _round_up(bs, bt)
    nsteps = bs_pad // bt

    # Zero-pad inputs / weights to the padded shapes (padding is mathematically
    # inert: padded H columns contribute 0 to the logits, padded SL positions are
    # masked before softmax, padded M columns of ctx are sliced off).
    x_p = jnp.pad(x, ((0, bs_pad - bs), (0, 0)))
    mem_p = jnp.pad(memory, ((0, bs_pad - bs), (0, sl_pad - sl), (0, m_pad - mem_dim)))
    w1_p = jnp.pad(w1, ((0, 0), (0, h_pad - hidden)))
    b1_p = jnp.pad(b1.reshape(1, -1), ((0, 0), (0, h_pad - hidden)))
    w2_p = jnp.pad(w2, ((0, m_pad - mem_dim), (0, h_pad - hidden)))
    b2_p = jnp.pad(b2.reshape(1, -1), ((0, 0), (0, h_pad - hidden)))
    vw_p = jnp.pad(vw.reshape(1, 1, -1), ((0, 0), (0, 0), (0, h_pad - hidden)))

    flops = 2 * bs_pad * (input_size * h_pad
                          + sl_pad * m_pad * h_pad
                          + sl_pad * h_pad
                          + sl_pad * m_pad)
    transcendentals = bs_pad * sl_pad * (h_pad + 1)
    bytes_accessed = itemsize * (x_p.size + mem_p.size + w1_p.size + b1_p.size
                                 + w2_p.size + b2_p.size + vw_p.size
                                 + bs_pad * m_pad + bs_pad * sl_pad)

    kernel = functools.partial(bah_attn_kernel, sl_valid=sl)

    ctx, score = pl.pallas_call(
        kernel,
        out_shape=(
            jax.ShapeDtypeStruct((bs_pad, m_pad), dtype),
            jax.ShapeDtypeStruct((bs_pad, sl_pad), dtype),
        ),
        grid_spec=pltpu.PrefetchScalarGridSpec(
            num_scalar_prefetch=0,
            grid=(nsteps,),
            in_specs=[
                pl.BlockSpec((bt, input_size), lambda i: (i, 0)),        # x tile
                pl.BlockSpec((bt, sl_pad, m_pad), lambda i: (i, 0, 0)),  # memory tile
                pl.BlockSpec((input_size, h_pad), lambda i: (0, 0)),     # W1
                pl.BlockSpec((1, h_pad), lambda i: (0, 0)),              # b1
                pl.BlockSpec((m_pad, h_pad), lambda i: (0, 0)),          # W2
                pl.BlockSpec((1, h_pad), lambda i: (0, 0)),              # b2
                pl.BlockSpec((1, 1, h_pad), lambda i: (0, 0, 0)),        # v weight (row)
            ],
            out_specs=[
                pl.BlockSpec((bt, m_pad), lambda i: (i, 0)),             # context (dense)
                pl.BlockSpec((bt, sl_pad), lambda i: (i, 0)),            # score
            ],
        ),
        compiler_params=pltpu.CompilerParams(
            dimension_semantics=("parallel",),
            vmem_limit_bytes=48 * 1024 * 1024),
        cost_estimate=pl.CostEstimate(
            flops=int(flops),
            transcendentals=int(transcendentals),
            bytes_accessed=int(bytes_accessed)),
    )(x_p, mem_p, w1_p, b1_p, w2_p, b2_p, vw_p)

    return ctx[:bs, :mem_dim], score[:bs, :sl]


def bah_attn_ref(x, memory, params):
    """Pure-JAX reference mirroring the PyTorch forward."""
    w1, b1, w2, b2, vw, vb = params
    h_x = x @ w1 + b1                                             # (bs, H)
    h_m = memory @ w2 + b2                                        # (bs, sl, H)
    s = jnp.tanh(h_x[:, None, :] + h_m) @ vw.reshape(-1, 1) + vb  # (bs, sl, 1)
    score = jax.nn.softmax(s[..., 0], axis=-1)                    # (bs, sl)
    ctx = jnp.sum(score[..., None] * memory, axis=1)              # (bs, mem_dim)
    return ctx, score


def init_params(key, input_size, hidden_size, direction, dtype=jnp.float32):
    mem_dim = hidden_size * direction
    ks = jax.random.split(key, 6)

    def lin(kw, kb, fan_in, fan_out):
        bound = 1.0 / jnp.sqrt(fan_in)
        w = jax.random.uniform(kw, (fan_in, fan_out), dtype, -bound, bound)
        b = jax.random.uniform(kb, (fan_out,), dtype, -bound, bound)
        return w, b

    w1, b1 = lin(ks[0], ks[1], input_size, hidden_size)
    w2, b2 = lin(ks[2], ks[3], mem_dim, hidden_size)
    vw, vb = lin(ks[4], ks[5], hidden_size, 1)
    return (w1, b1, w2, b2, vw, vb)


if __name__ == "__main__":
    bs, sl = 2, 8
    input_size, hidden_size, direction = 32, 32, 2
    mem_dim = hidden_size * direction

    key = jax.random.PRNGKey(0)
    kx, km, kp = jax.random.split(key, 3)
    x = jax.random.normal(kx, (bs, input_size), jnp.float32)
    memory = jax.random.normal(km, (bs, sl, mem_dim), jnp.float32)
    params = init_params(kp, input_size, hidden_size, direction)

    ctx, score = bah_attn_pallas(x, memory, params)
    jax.block_until_ready((ctx, score))

    ctx_ref, score_ref = bah_attn_ref(x, memory, params)
    assert ctx.shape == ctx_ref.shape and score.shape == score_ref.shape
    assert jnp.allclose(ctx, ctx_ref, atol=2e-3, rtol=2e-3), "context mismatch"
    assert jnp.allclose(score, score_ref, atol=2e-3, rtol=2e-3), "score mismatch"

    print("KERNEL_OK")
</pallas_src>

<mosaic_0001>
module attributes {stable_mosaic.version = 11 : i64} {
  func.func @bah_attn_kernel(%arg0: i32, %arg1: memref<8x32xf32, #tpu.memory_space<vmem>>, %arg2: memref<8x8x128xf32, #tpu.memory_space<vmem>>, %arg3: memref<32x128xf32, #tpu.memory_space<vmem>>, %arg4: memref<1x128xf32, #tpu.memory_space<vmem>>, %arg5: memref<128x128xf32, #tpu.memory_space<vmem>>, %arg6: memref<1x128xf32, #tpu.memory_space<vmem>>, %arg7: memref<1x1x128xf32, #tpu.memory_space<vmem>>, %arg8: memref<8x128xf32, #tpu.memory_space<vmem>>, %arg9: memref<8x8xf32, #tpu.memory_space<vmem>>) attributes {dimension_semantics = [#tpu.dimension_semantics<parallel>], iteration_bounds = array<i64: 1>, scalar_prefetch = 0 : i64, scratch_operands = 0 : i64, tpu.core_type = #tpu.core_type<tc>, window_params = [{transform_indices = @transform_0, window_bounds = array<i64: 8, 32>}, {transform_indices = @transform_1, window_bounds = array<i64: 8, 8, 128>}, {pipeline_mode = #tpu.pipeline_mode<synchronous>, transform_indices = @transform_2, window_bounds = array<i64: 32, 128>}, {pipeline_mode = #tpu.pipeline_mode<synchronous>, transform_indices = @transform_3, window_bounds = array<i64: 1, 128>}, {pipeline_mode = #tpu.pipeline_mode<synchronous>, transform_indices = @transform_4, window_bounds = array<i64: 128, 128>}, {pipeline_mode = #tpu.pipeline_mode<synchronous>, transform_indices = @transform_5, window_bounds = array<i64: 1, 128>}, {pipeline_mode = #tpu.pipeline_mode<synchronous>, transform_indices = @transform_6, window_bounds = array<i64: 1, 1, 128>}, {transform_indices = @transform_7, window_bounds = array<i64: 8, 128>}, {transform_indices = @transform_8, window_bounds = array<i64: 8, 8>}]} {
    %c0 = arith.constant 0 : index
    %c0_0 = arith.constant 0 : index
    %0 = vector.load %arg1[%c0, %c0_0] : memref<8x32xf32, #tpu.memory_space<vmem>>, vector<8x32xf32>
    %c0_1 = arith.constant 0 : index
    %c0_2 = arith.constant 0 : index
    %c0_3 = arith.constant 0 : index
    %1 = vector.load %arg2[%c0_1, %c0_2, %c0_3] : memref<8x8x128xf32, #tpu.memory_space<vmem>>, vector<8x8x128xf32>
    %c0_4 = arith.constant 0 : index
    %c0_5 = arith.constant 0 : index
    %2 = vector.load %arg3[%c0_4, %c0_5] : memref<32x128xf32, #tpu.memory_space<vmem>>, vector<32x128xf32>
    %cst = arith.constant dense<0.000000e+00> : vector<8x128xf32>
    %3 = tpu.matmul %0, %2, %cst {dimension_numbers = #tpu.dot_dimension_numbers<[1], [0], [0], [1], [0, 0, 1, 1], [], []>} : vector<8x32xf32>, vector<32x128xf32>, vector<8x128xf32> -> vector<8x128xf32>
    %c0_6 = arith.constant 0 : index
    %c0_7 = arith.constant 0 : index
    %4 = vector.load %arg4[%c0_6, %c0_7] : memref<1x128xf32, #tpu.memory_space<vmem>>, vector<1x128xf32>
    %5 = vector.broadcast %4 : vector<1x128xf32> to vector<8x128xf32>
    %6 = arith.addf %3, %5 : vector<8x128xf32>
    %7 = vector.shape_cast %1 : vector<8x8x128xf32> to vector<64x128xf32>
    %c0_8 = arith.constant 0 : index
    %c0_9 = arith.constant 0 : index
    %8 = vector.load %arg5[%c0_8, %c0_9] : memref<128x128xf32, #tpu.memory_space<vmem>>, vector<128x128xf32>
    %cst_10 = arith.constant dense<0.000000e+00> : vector<64x128xf32>
    %9 = tpu.matmul %7, %8, %cst_10 {dimension_numbers = #tpu.dot_dimension_numbers<[1], [0], [0], [1], [0, 0, 1, 1], [], []>} : vector<64x128xf32>, vector<128x128xf32>, vector<64x128xf32> -> vector<64x128xf32>
    %c0_11 = arith.constant 0 : index
    %c0_12 = arith.constant 0 : index
    %10 = vector.load %arg6[%c0_11, %c0_12] : memref<1x128xf32, #tpu.memory_space<vmem>>, vector<1x128xf32>
    %11 = vector.broadcast %10 : vector<1x128xf32> to vector<64x128xf32>
    %12 = arith.addf %9, %11 : vector<64x128xf32>
    %13 = vector.shape_cast %12 : vector<64x128xf32> to vector<8x8x128xf32>
    %14 = vector.shape_cast %6 : vector<8x128xf32> to vector<8x1x128xf32>
    %15 = vector.broadcast %14 : vector<8x1x128xf32> to vector<8x8x128xf32>
    %16 = arith.addf %15, %13 : vector<8x8x128xf32>
    %17 = math.tanh %16 : vector<8x8x128xf32>
    %c0_13 = arith.constant 0 : index
    %c0_14 = arith.constant 0 : index
    %c0_15 = arith.constant 0 : index
    %18 = vector.load %arg7[%c0_13, %c0_14, %c0_15] : memref<1x1x128xf32, #tpu.memory_space<vmem>>, vector<1x1x128xf32>
    %19 = vector.broadcast %18 : vector<1x1x128xf32> to vector<8x8x128xf32>
    %20 = arith.mulf %17, %19 : vector<8x8x128xf32>
    %cst_16 = arith.constant dense<0.000000e+00> : vector<8x8xf32>
    %21 = vector.multi_reduction <add>, %20, %cst_16 [2] : vector<8x8x128xf32> to vector<8x8xf32>
    %cst_17 = arith.constant dense<0xFF800000> : vector<8xf32>
    %22 = vector.multi_reduction <maximumf>, %21, %cst_17 [1] : vector<8x8xf32> to vector<8xf32>
    %23 = vector.shape_cast %22 : vector<8xf32> to vector<8x1xf32>
    %24 = vector.broadcast %23 : vector<8x1xf32> to vector<8x8xf32>
    %25 = arith.subf %21, %24 : vector<8x8xf32>
    %26 = math.exp %25 : vector<8x8xf32>
    %cst_18 = arith.constant dense<0.000000e+00> : vector<8xf32>
    %27 = vector.multi_reduction <add>, %26, %cst_18 [1] : vector<8x8xf32> to vector<8xf32>
    %28 = vector.shape_cast %27 : vector<8xf32> to vector<8x1xf32>
    %29 = vector.broadcast %28 : vector<8x1xf32> to vector<8x8xf32>
    %30 = arith.divf %26, %29 : vector<8x8xf32>
    %31 = vector.shape_cast %30 : vector<8x8xf32> to vector<8x8x1xf32>
    %32 = vector.broadcast %31 : vector<8x8x1xf32> to vector<8x8x128xf32>
    %33 = arith.mulf %32, %1 : vector<8x8x128xf32>
    %cst_19 = arith.constant dense<0.000000e+00> : vector<8x128xf32>
    %34 = vector.multi_reduction <add>, %33, %cst_19 [1] : vector<8x8x128xf32> to vector<8x128xf32>
    %c0_20 = arith.constant 0 : index
    %c0_21 = arith.constant 0 : index
    %35 = vector.load %arg8[%c0_20, %c0_21] : memref<8x128xf32, #tpu.memory_space<vmem>>, vector<8x128xf32>
    tpu.vector_store %arg8[%c0_20, %c0_21], %34 {strides = array<i32>} : memref<8x128xf32, #tpu.memory_space<vmem>>, vector<8x128xf32>,
    %c0_22 = arith.constant 0 : index
    %c0_23 = arith.constant 0 : index
    %36 = vector.load %arg9[%c0_22, %c0_23] : memref<8x8xf32, #tpu.memory_space<vmem>>, vector<8x8xf32>
    tpu.vector_store %arg9[%c0_22, %c0_23], %30 {strides = array<i32>} : memref<8x8xf32, #tpu.memory_space<vmem>>, vector<8x8xf32>,
    return
  }
  func.func @transform_0(%arg0: i32) -> (i32, i32) {
    %c0_i32 = arith.constant 0 : i32
    %c0_i32_0 = arith.constant 0 : i32
    return %arg0, %c0_i32 : i32, i32
  }
  func.func @transform_1(%arg0: i32) -> (i32, i32, i32) {
    %c0_i32 = arith.constant 0 : i32
    %c0_i32_0 = arith.constant 0 : i32
    %c0_i32_1 = arith.constant 0 : i32
    return %arg0, %c0_i32, %c0_i32_0 : i32, i32, i32
  }
  func.func @transform_2(%arg0: i32) -> (i32, i32) {
    %c0_i32 = arith.constant 0 : i32
    %c0_i32_0 = arith.constant 0 : i32
    %c0_i32_1 = arith.constant 0 : i32
    return %c0_i32, %c0_i32_0 : i32, i32
  }
  func.func @transform_3(%arg0: i32) -> (i32, i32) {
    %c0_i32 = arith.constant 0 : i32
    %c0_i32_0 = arith.constant 0 : i32
    %c0_i32_1 = arith.constant 0 : i32
    return %c0_i32, %c0_i32_0 : i32, i32
  }
  func.func @transform_4(%arg0: i32) -> (i32, i32) {
    %c0_i32 = arith.constant 0 : i32
    %c0_i32_0 = arith.constant 0 : i32
    %c0_i32_1 = arith.constant 0 : i32
    return %c0_i32, %c0_i32_0 : i32, i32
  }
  func.func @transform_5(%arg0: i32) -> (i32, i32) {
    %c0_i32 = arith.constant 0 : i32
    %c0_i32_0 = arith.constant 0 : i32
    %c0_i32_1 = arith.constant 0 : i32
    return %c0_i32, %c0_i32_0 : i32, i32
  }
  func.func @transform_6(%arg0: i32) -> (i32, i32, i32) {
    %c0_i32 = arith.constant 0 : i32
    %c0_i32_0 = arith.constant 0 : i32
    %c0_i32_1 = arith.constant 0 : i32
    %c0_i32_2 = arith.constant 0 : i32
    return %c0_i32, %c0_i32_0, %c0_i32_1 : i32, i32, i32
  }
  func.func @transform_7(%arg0: i32) -> (i32, i32) {
    %c0_i32 = arith.constant 0 : i32
    %c0_i32_0 = arith.constant 0 : i32
    return %arg0, %c0_i32 : i32, i32
  }
  func.func @transform_8(%arg0: i32) -> (i32, i32) {
    %c0_i32 = arith.constant 0 : i32
    %c0_i32_0 = arith.constant 0 : i32
    return %arg0, %c0_i32 : i32, i32
  }
}

</mosaic_0001>

<bundles_post_ra>
// kernel: tpu_custom_call.1
= control target key start
LH: loop header
LB: loop body
LE: loop exit
PB: predicated region body
PF: predicated region fallthrough
CT: control target
= control target key end

     0   :  { %14 = vsyncpa [#allocation3], 0  ;;  %s1262_s0 = inlined_call_operand.hbm [shape: f32[8,32], index: 0, kind: input, shape index: {}]   ;;  %s1263_s1 = inlined_call_operand.hbm [shape: f32[8,8,128], index: 1, kind: input, shape index: {}]   ;;  %s1264_s2 = inlined_call_operand.hbm [shape: f32[32,128], index: 2, kind: input, shape index: {}]   ;;  %s1265_s3 = inlined_call_operand.vmem [shape: f32[1,128], index: 3, kind: input, shape index: {}]   ;;  %s1266_s4 = inlined_call_operand.hbm [shape: f32[128,128], index: 4, kind: input, shape index: {}]   ;;  %s1267_s5 = inlined_call_operand.vmem [shape: f32[1,128], index: 5, kind: input, shape index: {}]   ;;  %s1268_s6 = inlined_call_operand.vmem [shape: f32[1,1,128], index: 6, kind: input, shape index: {}]   ;;  %s1269_s7 = inlined_call_operand.hbm [shape: f32[8,128], index: 7, kind: output, shape index: {0}]   ;;  %s1270_s8 = inlined_call_operand.hbm [shape: f32[8,8], index: 8, kind: output, shape index: {1}]  }
   0x1   :  { %15 = vsyncpa [#allocation6], 0 }
   0x2   :  { %16 = vsyncpa [#allocation9], 0 }
   0x3   :  { %17 = vsyncpa [#allocation4], 0  ;;  %s34_s29 = sshll.u32 %s1263_s1, 4  ;;  %s35_s29 = int_to_ptr.hbm [resolvable:$true] %s34_s29 }
   0x4   :  { %18 = vsyncpa [#allocation12], 0  ;;  %s958_s30 = smov [#allocation5]   ;;  %s24_s12 = sshll.u32 %s1262_s0, 4  ;;  %s25_s12 = int_to_ptr.hbm [resolvable:$true] %s24_s12 }
   0x5   :  { %s36_s9 = sshll.u32 %s958_s30, 4  ;;  %s959_s13 = smov 128   ;;  %s37_s9 = int_to_ptr.vmem [resolvable:$true] %s36_s9 }
   0x6   :  { %s960_s14 = smov 8   ;;  %s961_s15 = smov [#allocation2]  }
   0x7   :  { %42 = dma.hbm_to_vmem [thread:$0]  %s35_s29, 1024, %s37_s9, [#allocation6], %s959_s13, %s959_s13, %s960_s14  }
   0x8   :  { %s26_s16 = sshll.u32 %s961_s15, 4  ;;  %s47_s19 = sshll.u32 %s1264_s2, 4  ;;  %s27_s16 = int_to_ptr.vmem [resolvable:$true] %s26_s16  ;;  %s48_s19 = int_to_ptr.hbm [resolvable:$true] %s47_s19 }
   0x9   :  { %29 = dma.hbm_to_vmem [thread:$0]  %s25_s12, 128, %s27_s16, [#allocation3]  }
   0xa   :  { %s62_s21 = sshll.u32 %s1266_s4, 4  ;;  %s962_s22 = smov [#allocation7]   ;;  %s63_s21 = int_to_ptr.hbm [resolvable:$true] %s62_s21 }
   0xb   :  { %s49_s23 = sshll.u32 %s962_s22, 4  ;;  %s963_s0 = smov [#allocation8]   ;;  %s50_s23 = int_to_ptr.vmem [resolvable:$true] %s49_s23 }
   0xc   :  { %55 = dma.hbm_to_vmem [thread:$0]  %s48_s19, 512, %s50_s23, [#allocation6], %s959_s13, %s959_s13, %s960_s14  }
   0xd   :  { %s64_s24 = sshll.u32 %s963_s0, 4  ;;  %s65_s24 = int_to_ptr.vmem [resolvable:$true] %s64_s24 }
   0xe   :  { %70 = dma.hbm_to_vmem [thread:$0]  %s63_s21, 2048, %s65_s24, [#allocation9], %s959_s13, %s959_s13, %s960_s14  }
   0xf   :  { %948 = dma.done.wait [#allocation3], 128  }
  0x10   :  { %949 = vsyncadd [#allocation3], 4294967168 }
  0x11   :  { %950 = dma.done.wait [#allocation6], 1536  }
  0x12   :  { %951 = vsyncadd [#allocation6], 4294965760 }
  0x13   :  { %952 = dma.done.wait [#allocation9], 2048  }
  0x14   :  { %953 = vsyncadd [#allocation9], 4294965248  ;;  %v103_v0 = vld [vmem:[#allocation7 + $0x18] sm:$0xff]  ;;  %v102_v2 = vld [vmem:[#allocation7 + $0x10] sm:$0xff]  ;;  %vm108_vm0 = vcmask 261120   ;;  %vm279_vm1 = vcmask 1041409  }
  0x15   :  { %v147_v1 = vld [vmem:[#allocation8 + $0x78] sm:$0xff]  ;;  %124 = vmatpush.msra.mxu1 %v103_v0  ;;  %v146_v3 = vld [vmem:[#allocation8 + $0x70] sm:$0xff]  ;;  %v101_v4 = vld [vmem:[#allocation7 + $0x8] sm:$0xff]  ;;  %vm281_vm2 = vcmask 1042434   ;;  %vm283_vm3 = vcmask 1043459   ;;  %vm285_vm4 = vcmask 1044484  }
  0x16   :  { %152 = vmatpush.msra.mxu0 %v147_v1  ;;  %694 = vmatpush.msra.mxu2 %v147_v1  ;;  %v145_v5 = vld [vmem:[#allocation8 + $0x68] sm:$0xff]  ;;  %v100_v6 = vld [vmem:[#allocation7] sm:$0xff]  ;;  %v143_v8 = vld [vmem:[#allocation8 + $0x58] sm:$0xff]  ;;  %vm287_vm5 = vcmask 1045509   ;;  %vm289_vm6 = vcmask 1046534   ;;  %vm1272_vm7 = vcmask 1047559  }
  0x17   :  { %695 = vmatpush.msra.mxu3 %v147_v1  ;;  %125 = vmatpush.msra.mxu1 %v102_v2  ;;  %v144_v7 = vld [vmem:[#allocation8 + $0x60] sm:$0xff]  ;;  %v142_v9 = vld [vmem:[#allocation8 + $0x50] sm:$0xff]  ;;  %v141_v10 = vld [vmem:[#allocation8 + $0x48] sm:$0xff]  ;;  %vm1271_vm8 = vcmask 64512   ;;  %s675_s30 = sshll.u32 %s1270_s8, 4  ;;  %s966_s8 = smov [#allocation10]   ;;  %s676_s30 = int_to_ptr.hbm [resolvable:$true] %s675_s30 }
  0x18   :  { %153 = vmatpush.msra.mxu0 %v146_v3  ;;  %697 = vmatpush.msra.mxu2 %v146_v3  ;;  %v140_v11 = vld [vmem:[#allocation8 + $0x40] sm:$0xff]  ;;  %v139_v12 = vld [vmem:[#allocation8 + $0x38] sm:$0xff]  ;;  %v138_v13 = vld [vmem:[#allocation8 + $0x30] sm:$0xff]  ;;  %s662_s9 = sshll.u32 %s966_s8, 4  ;;  %s664_s12 = sshll.u32 %s1269_s7, 4  ;;  %s663_s9 = int_to_ptr.vmem [resolvable:$true] %s662_s9  ;;  %s665_s12 = int_to_ptr.hbm [resolvable:$true] %s664_s12 }
  0x19   :  { %698 = vmatpush.msra.mxu3 %v146_v3  ;;  %126 = vmatpush.msra.mxu1 %v101_v4  ;;  %v137_v14 = vld [vmem:[#allocation8 + $0x28] sm:$0xff]  ;;  %v136_v15 = vld [vmem:[#allocation8 + $0x20] sm:$0xff]  ;;  %v135_v16 = vld [vmem:[#allocation8 + $0x18] sm:$0xff] }
  0x1a   :  { %154 = vmatpush.msra.mxu0 %v145_v5  ;;  %700 = vmatpush.msra.mxu2 %v145_v5  ;;  %v134_v17 = vld [vmem:[#allocation8 + $0x10] sm:$0xff]  ;;  %v133_v18 = vld [vmem:[#allocation8 + $0x8] sm:$0xff]  ;;  %v91_v19 = vld [vmem:[#allocation2] sm:$0xff] }
  0x1b   :  { %701 = vmatpush.msra.mxu3 %v145_v5  ;;  %127 = vmatpush.msra.mxu1 %v100_v6  ;;  %v132_v20 = vld [vmem:[#allocation8] sm:$0xff]  ;;  %v1026_v22 = vld [vmem:[#allocation5 + $0x18] sm:$0xff]  ;;  %v1028_v23 = vld [vmem:[#allocation5 + $0x28] sm:$0xff] }
  0x1c   :  { %155 = vmatpush.msra.mxu0 %v144_v7  ;;  %703 = vmatpush.msra.mxu2 %v144_v7  ;;  %v1024_v21 = vld [vmem:[#allocation5] sm:$0xff]  ;;  %v1033_v24 = vld [vmem:[#allocation5 + $0x10] sm:$0xff]  ;;  %v1035_v25 = vld [vmem:[#allocation5 + $0x8] sm:$0xff] }
  0x1d   :  { %704 = vmatpush.msra.mxu3 %v144_v7  ;;  %693 = vmatpush.msrb.mxu1 %v147_v1  ;;  %v1037_v26 = vld [vmem:[#allocation5 + $0x20] sm:$0xff]  ;;  %v1039_v27 = vld [vmem:[#allocation5 + $0x30] sm:$0xff]  ;;  %v1045_v28 = vld [vmem:[#allocation5 + $0x38] sm:$0xff] }
  0x1e   :  { %156 = vmatpush.msra.mxu0 %v143_v8  ;;  %706 = vmatpush.msra.mxu2 %v143_v8  ;;  %v753_v29 = vld [vmem:[%s1265_s3] ss:$0 sm:$0xff]  ;;  %s965_s3 = smov [#allocation11]  }
  0x1f   :  { %707 = vmatpush.msra.mxu3 %v143_v8  ;;  %696 = vmatpush.msrb.mxu1 %v146_v3  ;;  %v754_v30 = vld [vmem:[%s1267_s5] ss:$0 sm:$0xff]  ;;  %s673_s5 = sshll.u32 %s965_s3, 4  ;;  %s674_s5 = int_to_ptr.vmem [resolvable:$true] %s673_s5 }
  0x20   :  { %157 = vmatpush.msra.mxu0 %v142_v9  ;;  %709 = vmatpush.msra.mxu2 %v142_v9  ;;  %v755_v42 = vld [vmem:[%s1268_s6] ss:$0 sm:$0xff] }
  0x21   :  { %710 = vmatpush.msra.mxu3 %v142_v9  ;;  %699 = vmatpush.msrb.mxu1 %v145_v5 }
  0x22   :  { %158 = vmatpush.msra.mxu0 %v141_v10  ;;  %712 = vmatpush.msra.mxu2 %v141_v10 }
  0x23   :  { %713 = vmatpush.msra.mxu3 %v141_v10  ;;  %702 = vmatpush.msrb.mxu1 %v144_v7 }
  0x24   :  { %159 = vmatpush.msra.mxu0 %v140_v11  ;;  %715 = vmatpush.msra.mxu2 %v140_v11 }
  0x25   :  { %716 = vmatpush.msra.mxu3 %v140_v11  ;;  %705 = vmatpush.msrb.mxu1 %v143_v8 }
  0x26   :  { %160 = vmatpush.msra.mxu0 %v139_v12  ;;  %718 = vmatpush.msra.mxu2 %v139_v12 }
  0x27   :  { %719 = vmatpush.msra.mxu3 %v139_v12  ;;  %708 = vmatpush.msrb.mxu1 %v142_v9 }
  0x28   :  { %161 = vmatpush.msra.mxu0 %v138_v13  ;;  %721 = vmatpush.msra.mxu2 %v138_v13 }
  0x29   :  { %722 = vmatpush.msra.mxu3 %v138_v13  ;;  %711 = vmatpush.msrb.mxu1 %v141_v10 }
  0x2a   :  { %162 = vmatpush.msra.mxu0 %v137_v14  ;;  %724 = vmatpush.msra.mxu2 %v137_v14 }
  0x2b   :  { %725 = vmatpush.msra.mxu3 %v137_v14  ;;  %714 = vmatpush.msrb.mxu1 %v140_v11 }
  0x2c   :  { %163 = vmatpush.msra.mxu0 %v136_v15  ;;  %727 = vmatpush.msra.mxu2 %v136_v15 }
  0x2d   :  { %728 = vmatpush.msra.mxu3 %v136_v15  ;;  %717 = vmatpush.msrb.mxu1 %v139_v12 }
  0x2e   :  { %164 = vmatpush.msra.mxu0 %v135_v16  ;;  %730 = vmatpush.msra.mxu2 %v135_v16 }
  0x2f   :  { %731 = vmatpush.msra.mxu3 %v135_v16  ;;  %720 = vmatpush.msrb.mxu1 %v138_v13 }
  0x30   :  { %165 = vmatpush.msra.mxu0 %v134_v17  ;;  %733 = vmatpush.msra.mxu2 %v134_v17 }
  0x31   :  { %734 = vmatpush.msra.mxu3 %v134_v17  ;;  %723 = vmatpush.msrb.mxu1 %v137_v14 }
  0x32   :  { %166 = vmatpush.msra.mxu0 %v133_v18  ;;  %736 = vmatpush.msra.mxu2 %v133_v18 }
  0x33   :  { %737 = vmatpush.msra.mxu3 %v133_v18  ;;  %692 = vmatmul.msk.f32.vlgmr.msra.gmra.mxu1 %vm108_vm0, %v91_v19 }
  0x34   :  { %167 = vmatpush.msra.mxu0 %v132_v20  ;;  %726 = vmatpush.msrb.mxu1 %v136_v15 }
  0x35   :  { %739 = vmatpush.msra.mxu2 %v132_v20  ;;  %740 = vmatpush.msra.mxu3 %v132_v20 }
  0x36   :  { %168 = vmatmul.f32.vlgmr.msra.gmra.mxu0 %v1024_v21  ;;  %729 = vmatpush.msrb.mxu1 %v135_v16 }
  0x37   :  { %177 = vmatmul.f32.vlgmr.msra.gmra.mxu2 %v1026_v22  ;;  %183 = vmatmul.f32.vlgmr.msra.gmra.mxu3 %v1028_v23 }
  0x38   :  { %732 = vmatpush.msrb.mxu1 %v134_v17 }
  0x3a   :  { %735 = vmatpush.msrb.mxu1 %v133_v18 }
  0x3c   :  { %738 = vmatpush.msrb.mxu1 %v132_v20 }
  0x3d   :  { %174 = vmatmul.f32.vlgmr.msrb.gmra.mxu1 %v1033_v24 }
  0x3e   :  { %171 = vmatmul.f32.gmra.mxu0 %v1035_v25 }
  0x3f   :  { %180 = vmatmul.f32.gmra.mxu2 %v1037_v26  ;;  %186 = vmatmul.f32.gmra.mxu3 %v1039_v27 }
  0x47   :  { %189 = vmatmul.f32.gmra.mxu3 %v1045_v28 }
  0xb0   :  { %v129_v31 = vpop.f32.mrf.mxu1 }
  0xb1   :  { %v130_v32 = vadd.f32 %v753_v29, %v129_v31 }
  0xb3   :  { %v169_v33 = vpop.f32.mrf.mxu0  ;;  %v201_v35 = vperm.slane %v130_v32, 0  ;;  %v195_v37 = vrot.slane %v130_v32, 2  ;;  %v194_v38 = vrot.slane %v130_v32, 1  ;;  %v196_v43 = vrot.slane %v130_v32, 3 }
  0xb4   :  { %v170_v34 = vadd.f32 %v754_v30, %v169_v33  ;;  %v197_v53 = vrot.slane %v130_v32, 4  ;;  %v199_v56 = vrot.slane %v130_v32, 6  ;;  %v198_v59 = vrot.slane %v130_v32, 5 }
  0xb5   :  { %v203_v45 = vperm.slane %v195_v37, 0  ;;  %v202_v48 = vperm.slane %v194_v38, 0  ;;  %v204_v55 = vperm.slane %v196_v43, 0  ;;  %v200_v8 = vrot.slane %v130_v32, 7 }
  0xb6   :  { %v217_v36 = vadd.f32 %v201_v35, %v170_v34  ;;  %v205_v61 = vperm.slane %v197_v53, 0  ;;  %v207_v0 = vperm.slane %v199_v56, 0  ;;  %v206_v5 = vperm.slane %v198_v59, 0 }
  0xb7   :  { %v208_v14 = vperm.slane %v200_v8, 0  ;;  %v964_v59 = vmov 0  }
  0xb8   :  { %756 = vtanh.f32 %v217_v36  ;;  %752 = vset.pattern.permute.xlu2 %v964_v59  ;;  %751 = vset.pattern.permute.xlu1 %v964_v59 }
  0xb9   :  { %750 = vset.pattern.permute.xlu0 %v964_v59 }
  0xba   :  { %v178_v39 = vpop.f32.mrf.mxu2  ;;  %v184_v40 = vpop.f32.mrf.mxu3 }
  0xbb   :  { %v175_v41 = vpop.f32.mrf.mxu1  ;;  %v172_v46 = vpop.f32.mrf.mxu0  ;;  %v179_v50 = vadd.f32 %v754_v30, %v178_v39  ;;  %v185_v1 = vadd.f32 %v754_v30, %v184_v40 }
  0xbc   :  { %v176_v44 = vadd.f32 %v754_v30, %v175_v41  ;;  %v173_v47 = vadd.f32 %v754_v30, %v172_v46 }
  0xbd   :  { %v220_v57 = vadd.f32 %v204_v55, %v179_v50  ;;  %v222_v9 = vadd.f32 %v206_v5, %v185_v1 }
  0xbe   :  { %v757_v49 = vpop.eup %756  ;;  %v219_v51 = vadd.f32 %v203_v45, %v176_v44  ;;  %v218_v52 = vadd.f32 %v202_v48, %v173_v47 }
  0xbf   :  { %v237_v54 = vmul.f32 %v757_v49, %v755_v42 }
  0xc0   :  { %758 = vtanh.f32 %v219_v51 }
  0xc1   :  { %245 = vadd.xlane.f32.xlu0 %v237_v54  ;;  %760 = vtanh.f32 %v218_v52 }
  0xc2   :  { %v181_v58 = vpop.f32.mrf.mxu2  ;;  %v187_v62 = vpop.f32.mrf.mxu3  ;;  %762 = vtanh.f32 %v220_v57 }
  0xc3   :  { %v182_v60 = vadd.f32 %v754_v30, %v181_v58  ;;  %v188_v63 = vadd.f32 %v754_v30, %v187_v62 }
  0xc5   :  { %v221_v2 = vadd.f32 %v205_v61, %v182_v60  ;;  %v223_v3 = vadd.f32 %v207_v0, %v188_v63 }
  0xc6   :  { %v759_v4 = vpop.eup %758 }
  0xc7   :  { %764 = vtanh.f32 %v221_v2  ;;  %v761_v6 = vpop.eup %760  ;;  %v239_v7 = vmul.f32 %v759_v4, %v755_v42 }
  0xc8   :  { %766 = vtanh.f32 %v223_v3  ;;  %v238_v10 = vmul.f32 %v761_v6, %v755_v42  ;;  %v763_v12 = vpop.eup %762 }
  0xc9   :  { %249 = vadd.xlane.f32.xlu1 %v239_v7  ;;  %768 = vtanh.f32 %v222_v9  ;;  %v240_v19 = vmul.f32 %v763_v12, %v755_v42 }
  0xca   :  { %v190_v11 = vpop.f32.mrf.mxu3  ;;  %247 = vadd.xlane.f32.xlu0 %v238_v10 }
  0xcb   :  { %v191_v13 = vadd.f32 %v754_v30, %v190_v11  ;;  %v269_v30 = vlaneseq }
  0xcd   :  { %v765_v15 = vpop.eup %764  ;;  %v224_v17 = vadd.f32 %v208_v14, %v191_v13  ;;  %v1057_v37 = vand.u32 127, %v269_v30 }
  0xce   :  { %v767_v16 = vpop.eup %766  ;;  %v241_v18 = vmul.f32 %v765_v15, %v755_v42 }
  0xcf   :  { %770 = vtanh.f32 %v224_v17  ;;  %v243_v20 = vmul.f32 %v767_v16, %v755_v42  ;;  %v769_v29 = vpop.eup %768 }
  0xd0   :  { %253 = vadd.xlane.f32.xlu2 %v241_v18  ;;  %v242_v32 = vmul.f32 %v769_v29, %v755_v42 }
  0xd1   :  { %251 = vadd.xlane.f32.xlu1 %v240_v19 }
  0xd2   :  { %257 = vadd.xlane.f32.xlu0 %v243_v20 }
  0xd5   :  { %v771_v31 = vpop.eup %770 }
  0xd6   :  { %v244_v33 = vmul.f32 %v771_v31, %v755_v42 }
  0xd8   :  { %255 = vadd.xlane.f32.xlu2 %v242_v32 }
  0xd9   :  { %259 = vadd.xlane.f32.xlu1 %v244_v33 }
 0x134   :  { %v246_v34 = vpop.xlane.xlu0 %245 }
 0x135   :  { %v271_v40 = vperm.slane %v246_v34, %v1057_v37 }
 0x13c   :  { %v250_v35 = vpop.xlane.xlu1 %249 }
 0x13d   :  { %v248_v36 = vpop.xlane.xlu0 %247  ;;  %v273_v44 = vperm.slane %v250_v35, %v1057_v37 }
 0x13e   :  { %v272_v38 = vperm.slane %v248_v36, %v1057_v37 }
 0x140   :  { %v280_v43 = vsel %vm279_vm1, %v272_v38, %v271_v40 }
 0x141   :  { %v282_v45 = vsel %vm281_vm2, %v273_v44, %v280_v43 }
 0x143   :  { %v254_v39 = vpop.xlane.xlu2 %253 }
 0x144   :  { %v252_v41 = vpop.xlane.xlu1 %251  ;;  %v275_v48 = vperm.slane %v254_v39, %v1057_v37 }
 0x145   :  { %v274_v42 = vperm.slane %v252_v41, %v1057_v37  ;;  %v258_v47 = vpop.xlane.xlu0 %257 }
 0x146   :  { %v277_v51 = vperm.slane %v258_v47, %v1057_v37 }
 0x147   :  { %v284_v46 = vsel %vm283_vm3, %v274_v42, %v282_v45 }
 0x148   :  { %v286_v53 = vsel %vm285_vm4, %v275_v48, %v284_v46 }
 0x14b   :  { %v256_v49 = vpop.xlane.xlu2 %255 }
 0x14c   :  { %v276_v50 = vperm.slane %v256_v49, %v1057_v37  ;;  %v260_v52 = vpop.xlane.xlu1 %259 }
 0x14d   :  { %v278_v54 = vperm.slane %v260_v52, %v1057_v37 }
 0x14e   :  { %v288_v55 = vsel %vm287_vm5, %v276_v50, %v286_v53 }
 0x14f   :  { %v290_v56 = vsel %vm289_vm6, %v277_v51, %v288_v55 }
 0x150   :  { %v292_v57 = vsel %vm1272_vm7, %v278_v54, %v290_v56 }
 0x151   :  { %v295_v58 = vsel %vm1271_vm8, %v292_v57, -inf }
 0x152   :  { %296 = vmax.xlane.f32.xlu2 %v295_v58 }
 0x1c5   :  { %v297_v60 = vpop.xlane.xlu2 %296 }
 0x1c6   :  { %v301_v61 = vperm.slane %v297_v60, 2  ;;  %v300_v62 = vperm.slane %v297_v60, 1  ;;  %v299_v63 = vperm.slane %v297_v60, 0  ;;  %v302_v3 = vperm.slane %v297_v60, 3 }
 0x1c7   :  { %v303_v4 = vperm.slane %v297_v60, 4  ;;  %v306_v5 = vperm.slane %v297_v60, 7  ;;  %v304_v13 = vperm.slane %v297_v60, 5  ;;  %v305_v15 = vperm.slane %v297_v60, 6 }
 0x1c8   :  { %v317_v0 = vsub.f32 %v250_v35, %v301_v61  ;;  %v316_v1 = vsub.f32 %v248_v36, %v300_v62  ;;  %v315_v2 = vsub.f32 %v246_v34, %v299_v63  ;;  %v318_v9 = vsub.f32 %v252_v41, %v302_v3 }
 0x1c9   :  { %v319_v10 = vsub.f32 %v254_v39, %v303_v4  ;;  %v322_v11 = vsub.f32 %v260_v52, %v306_v5  ;;  %v320_v20 = vsub.f32 %v256_v49, %v304_v13  ;;  %v321_v29 = vsub.f32 %v258_v47, %v305_v15 }
 0x1ca   :  { %v327_v6 = vmul.f32 1.442695, %v317_v0  ;;  %v325_v7 = vmul.f32 1.442695, %v316_v1  ;;  %v323_v8 = vmul.f32 1.442695, %v315_v2 }
 0x1cb   :  { %v329_v12 = vmul.f32 1.442695, %v318_v9  ;;  %v331_v14 = vmul.f32 1.442695, %v319_v10  ;;  %v337_v17 = vmul.f32 1.442695, %v322_v11 }
 0x1cc   :  { %772 = vpow2.f32 %v327_v6  ;;  %v333_v31 = vmul.f32 1.442695, %v320_v20  ;;  %v335_v32 = vmul.f32 1.442695, %v321_v29 }
 0x1cd   :  { %774 = vpow2.f32 %v325_v7 }
 0x1ce   :  { %776 = vpow2.f32 %v323_v8 }
 0x1cf   :  { %778 = vpow2.f32 %v329_v12 }
 0x1d0   :  { %780 = vpow2.f32 %v331_v14 }
 0x1d1   :  { %782 = vpow2.f32 %v337_v17 }
 0x1d2   :  { %v1075_v16 = vpop.eup %772  ;;  %784 = vpow2.f32 %v333_v31 }
 0x1d3   :  { %v1077_v18 = vpop.eup %774  ;;  %354 = vperm.xlu2 %752, %v1075_v16   ;;  %786 = vpow2.f32 %v335_v32 }
 0x1d4   :  { %v1080_v19 = vpop.eup %776  ;;  %351 = vperm.xlu1 %751, %v1077_v18  }
 0x1d5   :  { %348 = vperm.xlu0 %750, %v1080_v19   ;;  %v1084_v33 = vpop.eup %778 }
 0x1d6   :  { %v1086_v34 = vpop.eup %780 }
 0x1d7   :  { %v1089_v30 = vpop.eup %782 }
 0x1d8   :  { %v1093_v35 = vpop.eup %784 }
 0x1d9   :  { %v1095_v36 = vpop.eup %786 }
 0x1db   :  { %357 = vperm.xlu2 %752, %v1084_v33  }
 0x1dc   :  { %360 = vperm.xlu1 %751, %v1086_v34  }
 0x1dd   :  { %369 = vperm.xlu0 %750, %v1089_v30  }
 0x1e3   :  { %363 = vperm.xlu2 %752, %v1093_v35  }
 0x1e4   :  { %366 = vperm.xlu1 %751, %v1095_v36  }
 0x22d   :  { %v355_v38 = vpop.permute.xlu2 %354 }
 0x22e   :  { %v373_v46 = vperm.slane %v355_v38, %v1057_v37 }
 0x235   :  { %v358_v41 = vpop.permute.xlu2 %357 }
 0x236   :  { %v374_v49 = vperm.slane %v358_v41, %v1057_v37 }
 0x23d   :  { %v364_v50 = vpop.permute.xlu2 %363 }
 0x23e   :  { %v376_v54 = vperm.slane %v364_v50, %v1057_v37 }
 0x246   :  { %v352_v39 = vpop.permute.xlu1 %351 }
 0x247   :  { %v349_v40 = vpop.permute.xlu0 %348  ;;  %v372_v43 = vperm.slane %v352_v39, %v1057_v37 }
 0x248   :  { %v371_v42 = vperm.slane %v349_v40, %v1057_v37 }
 0x24a   :  { %v379_v44 = vsel %vm279_vm1, %v372_v43, %v371_v42 }
 0x24b   :  { %v380_v47 = vsel %vm281_vm2, %v373_v46, %v379_v44 }
 0x24c   :  { %v381_v51 = vsel %vm283_vm3, %v374_v49, %v380_v47 }
 0x24e   :  { %v361_v45 = vpop.permute.xlu1 %360 }
 0x24f   :  { %v375_v48 = vperm.slane %v361_v45, %v1057_v37  ;;  %v370_v53 = vpop.permute.xlu0 %369 }
 0x250   :  { %v378_v57 = vperm.slane %v370_v53, %v1057_v37 }
 0x251   :  { %v382_v52 = vsel %vm285_vm4, %v375_v48, %v381_v51 }
 0x252   :  { %v383_v58 = vsel %vm287_vm5, %v376_v54, %v382_v52 }
 0x256   :  { %v367_v55 = vpop.permute.xlu1 %366 }
 0x257   :  { %v377_v56 = vperm.slane %v367_v55, %v1057_v37 }
 0x259   :  { %v384_v59 = vsel %vm289_vm6, %v377_v56, %v383_v58 }
 0x25a   :  { %v385_v60 = vsel %vm1272_vm7, %v378_v57, %v384_v59 }
 0x25b   :  { %v387_v61 = vsel %vm1271_vm8, %v385_v60, 0.0 }
 0x25c   :  { %388 = vadd.xlane.f32.xlu2 %v387_v61 }
 0x2cf   :  { %v389_v62 = vpop.xlane.xlu2 %388 }
 0x2d0   :  { %v391_v63 = vperm.slane %v389_v62, 0  ;;  %v392_v0 = vperm.slane %v389_v62, 1  ;;  %v1115_v1 = vperm.slane %v389_v62, 2  ;;  %v1117_v2 = vperm.slane %v389_v62, 3 }
 0x2d1   :  { %v1119_v3 = vperm.slane %v389_v62, 4  ;;  %v1121_v4 = vperm.slane %v389_v62, 5  ;;  %v1127_v9 = vperm.slane %v389_v62, 7  ;;  %v1129_v12 = vperm.slane %v389_v62, 6 }
 0x2d2   :  { %788 = vrcp.f32 %v391_v63  ;;  %v431_v5 = vand.u32 2147483647, %v392_v0  ;;  %v433_v6 = vand.u32 2147483648, %v392_v0  ;;  %v416_v7 = vand.u32 2147483647, %v391_v63 }
 0x2d3   :  { %790 = vrcp.f32 %v392_v0  ;;  %v418_v10 = vand.u32 2147483648, %v391_v63  ;;  %vm427_vm9 = vweird.f32 %v392_v0  ;;  %vm412_vm11 = vweird.f32 %v391_v63 }
 0x2d4   :  { %792 = vrcp.f32 %v1115_v1  ;;  %vm1133_vm10 = vcmp.eq.f32.partialorder %v431_v5, 8.507059e+37  ;;  %v434_v29 = vor.u32 1.1754944e-38, %v433_v6  ;;  %vm1139_vm12 = vcmp.eq.f32.partialorder %v416_v7, 8.507059e+37 }
 0x2d5   :  { %794 = vrcp.f32 %v1117_v2  ;;  %v419_v41 = vor.u32 1.1754944e-38, %v418_v10  ;;  %v463_v51 = vand.u32 2147483648, %v1117_v2  ;;  %v448_v53 = vand.u32 2147483648, %v1115_v1 }
 0x2d6   :  { %796 = vrcp.f32 %v1119_v3  ;;  %v446_v6 = vand.u32 2147483647, %v1115_v1 }
 0x2d7   :  { %798 = vrcp.f32 %v1121_v4 }
 0x2d8   :  { %v789_v8 = vpop.eup %788  ;;  %800 = vrcp.f32 %v1127_v9 }
 0x2d9   :  { %v791_v11 = vpop.eup %790  ;;  %v408_v13 = vmul.f32 %v789_v8, %v391_v63  ;;  %vm413_vm13 = vweird.f32 %v789_v8  ;;  %802 = vrcp.f32 %v1129_v12 }
 0x2da   :  { %v1131_v14 = vpop.eup %792  ;;  %v423_v15 = vmul.f32 %v791_v11, %v392_v0  ;;  %vm428_vm14 = vweird.f32 %v791_v11  ;;  %vm414_vm15 = vmor %vm412_vm11, %vm413_vm13  ;;  %vm457_vm11 = vweird.f32 %v1117_v2 }
 0x2db   :  { %v1137_v20 = vpop.eup %794  ;;  %v409_v31 = vsub.f32 1.0, %v408_v13  ;;  %v438_v38 = vmul.f32 %v1131_v14, %v1115_v1  ;;  %vm443_vm0 = vweird.f32 %v1131_v14  ;;  %vm429_vm8 = vmor %vm427_vm9, %vm428_vm14  ;;  %vm442_vm9 = vweird.f32 %v1115_v1 }
 0x2dc   :  { %v1145_v39 = vpop.eup %796  ;;  %v424_v40 = vsub.f32 1.0, %v423_v15  ;;  %v453_v43 = vmul.f32 %v1137_v20, %v1117_v2  ;;  %vm458_vm7 = vweird.f32 %v1137_v20  ;;  %v449_v1 = vor.u32 1.1754944e-38, %v448_v53 }
 0x2dd   :  { %v1150_v42 = vpop.eup %798  ;;  %v410_v44 = vmul.f32 %v789_v8, %v409_v31  ;;  %v439_v45 = vsub.f32 1.0, %v438_v38  ;;  %v468_v46 = vmul.f32 %v1145_v39, %v1119_v3  ;;  %v464_v15 = vor.u32 1.1754944e-38, %v463_v51 }
 0x2de   :  { %v425_v47 = vmul.f32 %v791_v11, %v424_v40  ;;  %v454_v48 = vsub.f32 1.0, %v453_v43  ;;  %v483_v49 = vmul.f32 %v1150_v42, %v1121_v4  ;;  %v1166_v59 = vpop.eup %800  ;;  %vm488_vm14 = vweird.f32 %v1150_v42 }
 0x2df   :  { %v411_v50 = vadd.f32 %v789_v8, %v410_v44  ;;  %v440_v52 = vmul.f32 %v1131_v14, %v439_v45  ;;  %v469_v58 = vsub.f32 1.0, %v468_v46  ;;  %v478_v38 = vand.u32 2147483648, %v1119_v3 }
 0x2e0   :  { %v426_v54 = vadd.f32 %v791_v11, %v425_v47  ;;  %v455_v55 = vmul.f32 %v1137_v20, %v454_v48  ;;  %v484_v63 = vsub.f32 1.0, %v483_v49  ;;  %v476_v43 = vand.u32 2147483647, %v1119_v3 }
 0x2e1   :  { %v415_v56 = vsel %vm414_vm15, %v789_v8, %v411_v50  ;;  %v441_v57 = vadd.f32 %v1131_v14, %v440_v52  ;;  %v461_v8 = vand.u32 2147483647, %v1117_v2  ;;  %v513_v2 = vmul.f32 %v1166_v59, %v1127_v9 }
 0x2e2   :  { %v430_v60 = vsel %vm429_vm8, %v791_v11, %v426_v54  ;;  %v420_v61 = vsel %vm1139_vm12, %v419_v41, %v415_v56  ;;  %v456_v62 = vadd.f32 %v1137_v20, %v455_v55  ;;  %vm444_vm8 = vmor %vm442_vm9, %vm443_vm0  ;;  %v1185_v11 = vpop.eup %802  ;;  %v485_v13 = vmul.f32 %v1150_v42, %v484_v63 }
 0x2e3   :  { %v435_v5 = vsel %vm1133_vm10, %v434_v29, %v430_v60  ;;  %v421_v0 = vmul.f32 %v1080_v19, %v420_v61  ;;  %vm459_vm12 = vmor %vm457_vm11, %vm458_vm7  ;;  %v445_v10 = vsel %vm444_vm8, %v1131_v14, %v441_v57  ;;  %v470_v19 = vmul.f32 %v1145_v39, %v469_v58 }
 0x2e4   :  { %v436_v7 = vmul.f32 %v1077_v18, %v435_v5  ;;  %v460_v18 = vsel %vm459_vm12, %v1137_v20, %v456_v62  ;;  %vm447_vm10 = vcmp.eq.f32.partialorder %v446_v6, 8.507059e+37  ;;  %vm462_vm13 = vcmp.eq.f32.partialorder %v461_v8, 8.507059e+37 }
 0x2e5   :  { %529 = vperm.xlu1 %751, %v421_v0   ;;  %v450_v17 = vsel %vm447_vm10, %v449_v1, %v445_v10  ;;  %v493_v29 = vand.u32 2147483648, %v1121_v4  ;;  %v465_v14 = vsel %vm462_vm13, %v464_v15, %v460_v18  ;;  %v471_v31 = vadd.f32 %v1145_v39, %v470_v19 }
 0x2e6   :  { %534 = vperm.xlu0 %750, %v436_v7   ;;  %vm473_vm7 = vweird.f32 %v1145_v39  ;;  %v498_v20 = vmul.f32 %v1185_v11, %v1129_v12  ;;  %v486_v32 = vadd.f32 %v1150_v42, %v485_v13  ;;  %v514_v40 = vsub.f32 1.0, %v513_v2 }
 0x2e7   :  { %v451_v41 = vmul.f32 %v1075_v16, %v450_v17  ;;  %vm472_vm15 = vweird.f32 %v1119_v3  ;;  %v466_v45 = vmul.f32 %v1084_v33, %v465_v14  ;;  %vm487_vm0 = vweird.f32 %v1121_v4 }
 0x2e8   :  { %v499_v44 = vsub.f32 1.0, %v498_v20  ;;  %v491_v46 = vand.u32 2147483647, %v1121_v4  ;;  %vm474_vm9 = vmor %vm472_vm15, %vm473_vm7  ;;  %v479_v49 = vor.u32 1.1754944e-38, %v478_v38  ;;  %v515_v3 = vmul.f32 %v1166_v59, %v514_v40 }
 0x2e9   :  { %vm489_vm11 = vmor %vm487_vm0, %vm488_vm14  ;;  %v475_v47 = vsel %vm474_vm9, %v1145_v39, %v471_v31  ;;  %v494_v50 = vor.u32 1.1754944e-38, %v493_v29  ;;  %vm477_vm8 = vcmp.eq.f32.partialorder %v476_v43, 8.507059e+37  ;;  %vm503_vm10 = vweird.f32 %v1185_v11 }
 0x2ea   :  { %v500_v48 = vmul.f32 %v1185_v11, %v499_v44  ;;  %v490_v16 = vsel %vm489_vm11, %v1150_v42, %v486_v32  ;;  %vm492_vm12 = vcmp.eq.f32.partialorder %v491_v46, 8.507059e+37  ;;  %v480_v33 = vsel %vm477_vm8, %v479_v49, %v475_v47 }
 0x2eb   :  { %v495_v51 = vsel %vm492_vm12, %v494_v50, %v490_v16  ;;  %v516_v52 = vadd.f32 %v1166_v59, %v515_v3  ;;  %vm518_vm13 = vweird.f32 %v1166_v59  ;;  %v508_v39 = vand.u32 2147483648, %v1129_v12 }
 0x2ec   :  { %v501_v4 = vadd.f32 %v1185_v11, %v500_v48  ;;  %v481_v42 = vmul.f32 %v1086_v34, %v480_v33  ;;  %v523_v53 = vand.u32 2147483648, %v1127_v9  ;;  %vm502_vm7 = vweird.f32 %v1129_v12 }
 0x2ed   :  { %539 = vperm.xlu1 %751, %v451_v41   ;;  %v506_v54 = vand.u32 2147483647, %v1129_v12  ;;  %v496_v55 = vmul.f32 %v1093_v35, %v495_v51  ;;  %vm517_vm14 = vweird.f32 %v1127_v9  ;;  %v521_v56 = vand.u32 2147483647, %v1127_v9  ;;  %vm504_vm15 = vmor %vm502_vm7, %vm503_vm10 }
 0x2ee   :  { %544 = vperm.xlu0 %750, %v466_v45   ;;  %vm519_vm0 = vmor %vm517_vm14, %vm518_vm13  ;;  %v505_v57 = vsel %vm504_vm15, %v1185_v11, %v501_v4  ;;  %v509_v58 = vor.u32 1.1754944e-38, %v508_v39  ;;  %v524_v60 = vor.u32 1.1754944e-38, %v523_v53  ;;  %vm1277_vm8 = vcmask 1047559  }
 0x2ef   :  { %v520_v34 = vsel %vm519_vm0, %v1166_v59, %v516_v52  ;;  %vm507_vm9 = vcmp.eq.f32.partialorder %v506_v54, 8.507059e+37  ;;  %vm522_vm11 = vcmp.eq.f32.partialorder %v521_v56, 8.507059e+37  ;;  %vm1278_vm12 = vcmask 64512  }
 0x2f0   :  { %v510_v61 = vsel %vm507_vm9, %v509_v58, %v505_v57  ;;  %v525_v12 = vsel %vm522_vm11, %v524_v60, %v520_v34 }
 0x2f1   :  { %v511_v35 = vmul.f32 %v1095_v36, %v510_v61  ;;  %v526_v62 = vmul.f32 %v1089_v30, %v525_v12 }
 0x2f5   :  { %549 = vperm.xlu1 %751, %v481_v42  }
 0x2f6   :  { %554 = vperm.xlu0 %750, %v496_v55  }
 0x2fd   :  { %559 = vperm.xlu1 %751, %v511_v35  }
 0x2fe   :  { %564 = vperm.xlu0 %750, %v526_v62  }
 0x357   :  { %v530_v9 = vpop.permute.xlu1 %529 }
 0x358   :  { %v535_v63 = vpop.permute.xlu0 %534  ;;  %v567_v5 = vmul.f32 %v530_v9, %v1024_v21  ;;  %v640_v21 = vperm.slane %v530_v9, %v1057_v37 }
 0x359   :  { %v568_v0 = vmul.f32 %v535_v63, %v1035_v25  ;;  %v641_v15 = vperm.slane %v535_v63, %v1057_v37 }
 0x35a   :  { %v575_v59 = vrot.slane %v567_v5, 4 }
 0x35b   :  { %v581_v6 = vrot.slane %v568_v0, 4  ;;  %v648_v38 = vsel %vm279_vm1, %v641_v15, %v640_v21 }
 0x35c   :  { %v576_v8 = vadd.f32 %v575_v59, %v567_v5 }
 0x35d   :  { %v582_v7 = vadd.f32 %v581_v6, %v568_v0 }
 0x35e   :  { %v577_v1 = vrot.slane %v576_v8, 2 }
 0x35f   :  { %v540_v10 = vpop.permute.xlu1 %539  ;;  %v583_v30 = vrot.slane %v582_v7, 2 }
 0x360   :  { %v545_v19 = vpop.permute.xlu0 %544  ;;  %v569_v11 = vmul.f32 %v540_v10, %v1033_v24  ;;  %v642_v29 = vperm.slane %v540_v10, %v1057_v37  ;;  %v578_v31 = vadd.f32 %v577_v1, %v576_v8 }
 0x361   :  { %v570_v36 = vmul.f32 %v545_v19, %v1026_v22  ;;  %v584_v14 = vadd.f32 %v583_v30, %v582_v7  ;;  %v643_v40 = vperm.slane %v545_v19, %v1057_v37 }
 0x362   :  { %v587_v18 = vrot.slane %v569_v11, 4  ;;  %v649_v44 = vsel %vm281_vm2, %v642_v29, %v648_v38  ;;  %v579_v48 = vrot.slane %v578_v31, 1 }
 0x363   :  { %v593_v13 = vrot.slane %v570_v36, 4  ;;  %v585_v47 = vrot.slane %v584_v14, 1  ;;  %v650_v33 = vsel %vm283_vm3, %v643_v40, %v649_v44 }
 0x364   :  { %v588_v2 = vadd.f32 %v587_v18, %v569_v11  ;;  %v580_v39 = vadd.f32 %v579_v48, %v578_v31 }
 0x365   :  { %v594_v25 = vadd.f32 %v593_v13, %v570_v36  ;;  %v586_v52 = vadd.f32 %v585_v47, %v584_v14 }
 0x366   :  { %v589_v17 = vrot.slane %v588_v2, 2 }
 0x367   :  { %v550_v20 = vpop.permute.xlu1 %549  ;;  %v595_v32 = vrot.slane %v594_v25, 2  ;;  %v631_v6 = vsel %vm279_vm1, %v586_v52, %v580_v39  ;;  %vm1279_vm1 = vmmov %vm1277_vm8 }
 0x368   :  { %v555_v24 = vpop.permute.xlu0 %554  ;;  %v571_v22 = vmul.f32 %v550_v20, %v1037_v26  ;;  %v590_v43 = vadd.f32 %v589_v17, %v588_v2  ;;  %v644_v46 = vperm.slane %v550_v20, %v1057_v37 }
 0x369   :  { %v572_v41 = vmul.f32 %v555_v24, %v1028_v23  ;;  %v596_v49 = vadd.f32 %v595_v32, %v594_v25  ;;  %v645_v26 = vperm.slane %v555_v24, %v1057_v37 }
 0x36a   :  { %v599_v45 = vrot.slane %v571_v22, 4  ;;  %v591_v51 = vrot.slane %v590_v43, 1  ;;  %v651_v23 = vsel %vm285_vm4, %v644_v46, %v650_v33 }
 0x36b   :  { %v605_v16 = vrot.slane %v572_v41, 4  ;;  %v597_v54 = vrot.slane %v596_v49, 1  ;;  %v652_v12 = vsel %vm287_vm5, %v645_v26, %v651_v23 }
 0x36c   :  { %v600_v3 = vadd.f32 %v599_v45, %v571_v22  ;;  %v592_v35 = vadd.f32 %v591_v51, %v590_v43 }
 0x36d   :  { %v606_v50 = vadd.f32 %v605_v16, %v572_v41 }
 0x36e   :  { %v601_v4 = vrot.slane %v600_v3, 2  ;;  %v632_v7 = vsel %vm281_vm2, %v592_v35, %v631_v6 }
 0x36f   :  { %v607_v42 = vrot.slane %v606_v50, 2  ;;  %v560_v53 = vpop.permute.xlu1 %559 }
 0x370   :  { %v602_v55 = vadd.f32 %v601_v4, %v600_v3  ;;  %v565_v56 = vpop.permute.xlu0 %564  ;;  %v573_v57 = vmul.f32 %v560_v53, %v1039_v27  ;;  %v646_v34 = vperm.slane %v560_v53, %v1057_v37 }
 0x371   :  { %v608_v58 = vadd.f32 %v607_v42, %v606_v50  ;;  %v574_v60 = vmul.f32 %v565_v56, %v1045_v28  ;;  %v647_v61 = vperm.slane %v565_v56, %v1057_v37  ;;  %v598_v28 = vadd.f32 %v597_v54, %v596_v49 }
 0x372   :  { %v603_v62 = vrot.slane %v602_v55, 1  ;;  %v611_v9 = vrot.slane %v573_v57, 4  ;;  %v653_v63 = vsel %vm289_vm6, %v646_v34, %v652_v12 }
 0x373   :  { %v617_v5 = vrot.slane %v574_v60, 4  ;;  %v654_v0 = vsel %vm1277_vm8, %v647_v61, %v653_v63  ;;  %v609_v59 = vrot.slane %v608_v58, 1  ;;  %v633_v30 = vsel %vm283_vm3, %v598_v28, %v632_v7 }
 0x374   :  { %v612_v27 = vadd.f32 %v611_v9, %v573_v57  ;;  %656 = vst.msk [vmem:[#allocation11] sm:$0xff] %vm1278_vm12, %v654_v0  ;;  %v604_v8 = vadd.f32 %v603_v62, %v602_v55 }
 0x375   :  { %v618_v37 = vadd.f32 %v617_v5, %v574_v60  ;;  %678 = dma.vmem_to_hbm [thread:$0]  %s674_s5, 128, %s676_s30, [#allocation12]   ;;  %v610_v36 = vadd.f32 %v609_v59, %v608_v58 }
 0x376   :  { %v613_v10 = vrot.slane %v612_v27, 2  ;;  %v634_v13 = vsel %vm285_vm4, %v604_v8, %v633_v30 }
 0x377   :  { %v619_v19 = vrot.slane %v618_v37, 2  ;;  %v635_v25 = vsel %vm287_vm5, %v610_v36, %v634_v13 }
 0x378   :  { %v614_v11 = vadd.f32 %v613_v10, %v612_v27 }
 0x379   :  { %v620_v18 = vadd.f32 %v619_v19, %v618_v37 }
 0x37a   :  { %v615_v1 = vrot.slane %v614_v11, 1 }
 0x37b   :  { %v621_v2 = vrot.slane %v620_v18, 1 }
 0x37c   :  { %v616_v15 = vadd.f32 %v615_v1, %v614_v11 }
 0x37d   :  { %v622_v21 = vadd.f32 %v621_v2, %v620_v18 }
 0x37e   :  { %v636_v17 = vsel %vm289_vm6, %v616_v15, %v635_v25 }
 0x37f   :  { %v637_v29 = vsel %vm1279_vm1, %v622_v21, %v636_v17 }
 0x380   :  { %639 = vst [vmem:[#allocation10] sm:$0xff] %v637_v29 }
 0x381   :  { %667 = dma.vmem_to_hbm [thread:$0]  %s663_s9, 128, %s665_s12, [#allocation4]  }
 0x382   :  { %954 = dma.done.wait [#allocation4], 128  }
 0x383   :  { %955 = vsyncadd [#allocation4], 4294967168 }
 0x384   :  { %956 = dma.done.wait [#allocation12], 128  }
 0x385   :  { %957 = vsyncadd [#allocation12], 4294967168 }
 0x386   :  { %687 = vsyncpa [#allocation3], 1 }
 0x387   :  { %688 = vsyncpa [#allocation6], 1 }
 0x388   :  { %689 = vsyncpa [#allocation9], 1 }
 0x389   :  { %690 = vsyncpa [#allocation4], 1 }
 0x38a   :  { %691 = vsyncpa [#allocation12], 1 }

</bundles_post_ra>
